<compile_context>
chip_gen: v5e
topology: v5e:2x2
jax: 0.10.0
libtpu: 0.0.40
codegen_flags: <defaults>
</compile_context>

<pallas_src>
import functools
import math

import jax
import jax.numpy as jnp
from jax.experimental import pallas as pl
from jax.experimental.pallas import tpu as pltpu


def embedding_kernel(feat_ref, w_ref, out_ref):
    # feat_ref: (tm_g, P*F) packed feat rows (lane-dense)
    # w_ref:    (P*F, P*E)  block-diagonal kron(I_P, W.T), VMEM-resident
    # out_ref:  (tm_g, P*E) == output rows, packed row-major
    acc = jnp.dot(feat_ref[...], w_ref[...],
                  preferred_element_type=jnp.float32)
    out_ref[...] = jnp.maximum(acc, 0.0).astype(out_ref.dtype)


def _pack_factor(feat_dim, embed_dim, max_pack=128):
    # Smallest P making both P*feat_dim and P*embed_dim multiples of 128
    # (lane-dense input and output tiles).  Correctness holds for any P;
    # the cap only bounds weight replication for awkward dims.
    pf = 128 // math.gcd(128, feat_dim)
    pe = 128 // math.gcd(128, embed_dim)
    p = pf * pe // math.gcd(pf, pe)
    return min(p, max_pack)


@functools.partial(jax.jit, static_argnames=("block_m",))
def embedding_forward(feat_matrix, weight, *, block_m=8192):
    m, feat_dim = feat_matrix.shape
    embed_dim = weight.shape[0]

    P = _pack_factor(feat_dim, embed_dim)

    # Pad rows to a multiple of the pack factor; padded zero rows produce
    # relu(0) = 0 and are sliced off at the end.
    m_pad = ((m + P - 1) // P) * P
    if m_pad != m:
        feat_matrix = jnp.pad(feat_matrix, ((0, m_pad - m), (0, 0)))
    m_g = m_pad // P

    # Lane-dense packed views (free row-major reshape) and block-diag weight:
    #   W'[p*F + f, q*E + e] = (p == q) * W[e, f]
    feat_packed = feat_matrix.reshape(m_g, P * feat_dim)
    w_packed = jnp.kron(jnp.eye(P, dtype=weight.dtype), weight.T)

    # Row-tile size in packed groups: large tiles amortize the ~0.35 us
    # per-grid-step overhead; cap at ceil(m_g/2) so the grid keeps >= 2 steps
    # (v7x megacore sharding); 8-sublane aligned.
    if m_g <= 8:
        tm_g = m_g                                  # tiny input: one full block
    else:
        tm_g = max(8, min(max(block_m // P, 1), pl.cdiv(m_g, 2)))
        tm_g = (tm_g // 8) * 8
    grid = (pl.cdiv(m_g, tm_g),)

    out_packed = pl.pallas_call(
        embedding_kernel,
        out_shape=jax.ShapeDtypeStruct((m_g, P * embed_dim), jnp.float32),
        grid_spec=pltpu.PrefetchScalarGridSpec(
            num_scalar_prefetch=0,
            grid=grid,
            in_specs=[
                # feat row-tile, streamed / double-buffered over the grid.
                pl.BlockSpec((tm_g, P * feat_dim), lambda i: (i, 0)),
                # tiny block-diagonal weight, resident across all grid steps.
                pl.BlockSpec((P * feat_dim, P * embed_dim), lambda i: (0, 0)),
            ],
            # lane-dense output block, already in (m, E) row-major order.
            out_specs=pl.BlockSpec((tm_g, P * embed_dim), lambda i: (i, 0)),
        ),
        compiler_params=pltpu.CompilerParams(
            dimension_semantics=("parallel",)),
    )(feat_packed, w_packed)

    out = out_packed.reshape(m_pad, embed_dim)
    if m_pad != m:
        out = out[:m]
    return out


def xavier_uniform(key, shape):
    fan_out, fan_in = shape
    bound = (6.0 / (fan_in + fan_out)) ** 0.5
    return jax.random.uniform(key, shape, dtype=jnp.float32,
                              minval=-bound, maxval=bound)


if __name__ == "__main__":
    # Small shapes consistent with the module.
    m_size, feat_dim, embed_dim = 256, 16, 8

    key = jax.random.PRNGKey(0)
    k_feat, k_w = jax.random.split(key)

    feat_matrix = jax.random.normal(k_feat, (m_size, feat_dim), dtype=jnp.float32)
    weight = xavier_uniform(k_w, (embed_dim, feat_dim))   # Embedding.weight

    out = embedding_forward(feat_matrix, weight)
    jax.block_until_ready(out)

    # Reference: relu(W @ feat.T).T
    ref = jnp.maximum(weight @ feat_matrix.T, 0.0).T
    assert out.shape == (m_size, embed_dim)
    assert jnp.allclose(out, ref, atol=1e-5, rtol=1e-5)

    # Ragged-m path: m not a multiple of the pack factor / row tile.
    m2 = 200
    feat2 = jax.random.normal(jax.random.PRNGKey(1), (m2, feat_dim),
                              dtype=jnp.float32)
    out2 = embedding_forward(feat2, weight)
    jax.block_until_ready(out2)
    ref2 = jnp.maximum(weight @ feat2.T, 0.0).T
    assert out2.shape == (m2, embed_dim)
    assert jnp.allclose(out2, ref2, atol=1e-5, rtol=1e-5)

    print("KERNEL_OK")
</pallas_src>

<mosaic_0001>
module attributes {stable_mosaic.version = 11 : i64} {
  func.func @embedding_kernel(%arg0: i32, %arg1: memref<8x256xf32, #tpu.memory_space<vmem>>, %arg2: memref<256x128xf32, #tpu.memory_space<vmem>>, %arg3: memref<8x128xf32, #tpu.memory_space<vmem>>) attributes {dimension_semantics = [#tpu.dimension_semantics<parallel>], iteration_bounds = array<i64: 2>, scalar_prefetch = 0 : i64, scratch_operands = 0 : i64, tpu.core_type = #tpu.core_type<tc>, window_params = [{transform_indices = @transform_0, window_bounds = array<i64: 8, 256>}, {pipeline_mode = #tpu.pipeline_mode<synchronous>, transform_indices = @transform_1, window_bounds = array<i64: 256, 128>}, {transform_indices = @transform_2, window_bounds = array<i64: 8, 128>}]} {
    %c0 = arith.constant 0 : index
    %c0_0 = arith.constant 0 : index
    %0 = vector.load %arg1[%c0, %c0_0] : memref<8x256xf32, #tpu.memory_space<vmem>>, vector<8x256xf32>
    %c0_1 = arith.constant 0 : index
    %c0_2 = arith.constant 0 : index
    %1 = vector.load %arg2[%c0_1, %c0_2] : memref<256x128xf32, #tpu.memory_space<vmem>>, vector<256x128xf32>
    %cst = arith.constant dense<0.000000e+00> : vector<8x128xf32>
    %2 = tpu.matmul %0, %1, %cst {dimension_numbers = #tpu.dot_dimension_numbers<[1], [0], [0], [1], [0, 0, 1, 1], [], []>} : vector<8x256xf32>, vector<256x128xf32>, vector<8x128xf32> -> vector<8x128xf32>
    %cst_3 = arith.constant 0.000000e+00 : f32
    %3 = vector.broadcast %cst_3 : f32 to vector<8x128xf32>
    %4 = arith.maximumf %2, %3 : vector<8x128xf32>
    %c0_4 = arith.constant 0 : index
    %c0_5 = arith.constant 0 : index
    %5 = vector.load %arg3[%c0_4, %c0_5] : memref<8x128xf32, #tpu.memory_space<vmem>>, vector<8x128xf32>
    tpu.vector_store %arg3[%c0_4, %c0_5], %4 {strides = array<i32>} : memref<8x128xf32, #tpu.memory_space<vmem>>, vector<8x128xf32>,
    return
  }
  func.func @transform_0(%arg0: i32) -> (i32, i32) {
    %c0_i32 = arith.constant 0 : i32
    %c0_i32_0 = arith.constant 0 : i32
    return %arg0, %c0_i32 : i32, i32
  }
  func.func @transform_1(%arg0: i32) -> (i32, i32) {
    %c0_i32 = arith.constant 0 : i32
    %c0_i32_0 = arith.constant 0 : i32
    %c0_i32_1 = arith.constant 0 : i32
    return %c0_i32, %c0_i32_0 : i32, i32
  }
  func.func @transform_2(%arg0: i32) -> (i32, i32) {
    %c0_i32 = arith.constant 0 : i32
    %c0_i32_0 = arith.constant 0 : i32
    return %arg0, %c0_i32 : i32, i32
  }
}

</mosaic_0001>

<bundles_post_ra>
// kernel: embedding_forward.1
= control target key start
LH: loop header
LB: loop body
LE: loop exit
PB: predicated region body
PF: predicated region fallthrough
CT: control target
= control target key end

     0   :  { %s313_s9 = smov 0   ;;  %s434_s0 = inlined_call_operand.vmem [shape: f32[16,256], index: 0, kind: input, shape index: {}]   ;;  %s435_s1 = inlined_call_operand.vmem [shape: f32[256,128], index: 1, kind: input, shape index: {}]   ;;  %s436_s2 = inlined_call_operand.vmem [shape: f32[16,128], index: 2, kind: output, shape index: {}]  }
   0x1 LB: > { %s271_s10 = sadd.s32 4294967295, %s296_s9   ;;  %p275_p0 = scmp.ge.s32.totalorder %s296_s9, 1  ;;  %s296_s9 = sphi %s313_s9, %s12_s9  }
   0x2   : > { %p112_p1 = scmp.lt.s32.totalorder %s296_s9, 3 }
   0x4   : > { %p113_p2 = pnand %p275_p0, %p112_p1 }
   0x5   : > { %p133_p3 = scmp.lt.s32.totalorder (!%p113_p2), %s271_s10, 1 }
   0x6   : > { %116 = sbr.rel (%p113_p2) target bundleno = 175 (0xaf), region = 28 }
   0xb   : > { %v159_v0 = vld [vmem:[%s435_s1 + $0x78] sm:$0xff]  ;;  %v158_v2 = vld [vmem:[%s435_s1 + $0x70] sm:$0xff]  ;;  %v157_v4 = vld [vmem:[%s435_s1 + $0x68] sm:$0xff]  ;;  %s438_s10 = smov (!%p133_p3, %s271_s10), 1 }
   0xc   : > { %v175_v1 = vld [vmem:[%s435_s1 + $0xf8] sm:$0xff]  ;;  %176 = vmatpush.msra.mxu0 %v159_v0  ;;  %v174_v3 = vld [vmem:[%s435_s1 + $0xf0] sm:$0xff]  ;;  %v173_v5 = vld [vmem:[%s435_s1 + $0xe8] sm:$0xff]  ;;  %s281_s11 = sshll.u32 %s438_s10, 4  ;;  %s278_s27 = sshll.u32 %s438_s10, 3 }
   0xd   : > { %196 = vmatpush.msra.mxu1 %v175_v1  ;;  %v156_v6 = vld [vmem:[%s435_s1 + $0x60] sm:$0xff]  ;;  %v155_v8 = vld [vmem:[%s435_s1 + $0x58] sm:$0xff]  ;;  %v154_v10 = vld [vmem:[%s435_s1 + $0x50] sm:$0xff]  ;;  %s137_s22 = scalar_lea.vmem %s434_s0, %s281_s11  ;;  %s141_s30 = scalar_lea.vmem %s436_s2, %s278_s27 }
   0xe   : > { %177 = vmatpush.msra.mxu0 %v158_v2  ;;  %v172_v7 = vld [vmem:[%s435_s1 + $0xe0] sm:$0xff]  ;;  %v171_v9 = vld [vmem:[%s435_s1 + $0xd8] sm:$0xff]  ;;  %v170_v11 = vld [vmem:[%s435_s1 + $0xd0] sm:$0xff] }
   0xf   : > { %197 = vmatpush.msra.mxu1 %v174_v3  ;;  %v153_v12 = vld [vmem:[%s435_s1 + $0x48] sm:$0xff]  ;;  %v152_v14 = vld [vmem:[%s435_s1 + $0x40] sm:$0xff]  ;;  %v151_v16 = vld [vmem:[%s435_s1 + $0x38] sm:$0xff] }
  0x10   : > { %178 = vmatpush.msra.mxu0 %v157_v4  ;;  %v169_v13 = vld [vmem:[%s435_s1 + $0xc8] sm:$0xff]  ;;  %v168_v15 = vld [vmem:[%s435_s1 + $0xc0] sm:$0xff]  ;;  %v167_v17 = vld [vmem:[%s435_s1 + $0xb8] sm:$0xff] }
  0x11   : > { %198 = vmatpush.msra.mxu1 %v173_v5  ;;  %v150_v18 = vld [vmem:[%s435_s1 + $0x30] sm:$0xff]  ;;  %v149_v20 = vld [vmem:[%s435_s1 + $0x28] sm:$0xff]  ;;  %v148_v22 = vld [vmem:[%s435_s1 + $0x20] sm:$0xff] }
  0x12   : > { %179 = vmatpush.msra.mxu0 %v156_v6  ;;  %v166_v19 = vld [vmem:[%s435_s1 + $0xb0] sm:$0xff]  ;;  %v165_v21 = vld [vmem:[%s435_s1 + $0xa8] sm:$0xff]  ;;  %v164_v23 = vld [vmem:[%s435_s1 + $0xa0] sm:$0xff] }
  0x13   : > { %199 = vmatpush.msra.mxu1 %v172_v7  ;;  %v147_v24 = vld [vmem:[%s435_s1 + $0x18] sm:$0xff]  ;;  %v146_v26 = vld [vmem:[%s435_s1 + $0x10] sm:$0xff]  ;;  %v145_v28 = vld [vmem:[%s435_s1 + $0x8] sm:$0xff] }
  0x14   : > { %180 = vmatpush.msra.mxu0 %v155_v8  ;;  %v163_v25 = vld [vmem:[%s435_s1 + $0x98] sm:$0xff]  ;;  %v162_v27 = vld [vmem:[%s435_s1 + $0x90] sm:$0xff]  ;;  %v161_v29 = vld [vmem:[%s435_s1 + $0x88] sm:$0xff] }
  0x15   : > { %200 = vmatpush.msra.mxu1 %v171_v9  ;;  %v144_v30 = vld [vmem:[%s435_s1] sm:$0xff]  ;;  %v143_v33 = vld [vmem:[%s137_s22 + $0x8] sm:$0xff] }
  0x16   : > { %181 = vmatpush.msra.mxu0 %v154_v10  ;;  %v160_v31 = vld [vmem:[%s435_s1 + $0x80] sm:$0xff] }
  0x17   : > { %201 = vmatpush.msra.mxu1 %v170_v11  ;;  %v142_v32 = vld [vmem:[%s137_s22] sm:$0xff] }
  0x18   : > { %182 = vmatpush.msra.mxu0 %v153_v12 }
  0x19   : > { %202 = vmatpush.msra.mxu1 %v169_v13 }
  0x1a   : > { %183 = vmatpush.msra.mxu0 %v152_v14 }
  0x1b   : > { %203 = vmatpush.msra.mxu1 %v168_v15 }
  0x1c   : > { %184 = vmatpush.msra.mxu0 %v151_v16 }
  0x1d   : > { %204 = vmatpush.msra.mxu1 %v167_v17 }
  0x1e   : > { %185 = vmatpush.msra.mxu0 %v150_v18 }
  0x1f   : > { %205 = vmatpush.msra.mxu1 %v166_v19 }
  0x20   : > { %186 = vmatpush.msra.mxu0 %v149_v20 }
  0x21   : > { %206 = vmatpush.msra.mxu1 %v165_v21 }
  0x22   : > { %187 = vmatpush.msra.mxu0 %v148_v22 }
  0x23   : > { %207 = vmatpush.msra.mxu1 %v164_v23 }
  0x24   : > { %188 = vmatpush.msra.mxu0 %v147_v24 }
  0x25   : > { %208 = vmatpush.msra.mxu1 %v163_v25 }
  0x26   : > { %189 = vmatpush.msra.mxu0 %v146_v26 }
  0x27   : > { %209 = vmatpush.msra.mxu1 %v162_v27 }
  0x28   : > { %190 = vmatpush.msra.mxu0 %v145_v28 }
  0x29   : > { %210 = vmatpush.msra.mxu1 %v161_v29 }
  0x2a   : > { %191 = vmatpush.msra.mxu0 %v144_v30 }
  0x2b   : > { %211 = vmatpush.msra.mxu1 %v160_v31  ;;  %192 = vmatmul.f32.vlgmr.msra.gmra.mxu0 %v142_v32 }
  0x2c   : > { %212 = vmatmul.f32.vlgmr.msra.gmra.mxu1 %v143_v33 }
  0xa8   : > { %v193_v34 = vpop.f32.mrf.mxu0 }
  0xa9   : > { %v213_v35 = vpop.f32.mrf.mxu1 }
  0xaa   : > { %v214_v36 = vadd.f32 %v213_v35, %v193_v34 }
  0xac   : > { %v216_v37 = vmax.f32 %v214_v36, 0.0 }
  0xae   : > { %217 = vst [vmem:[%s141_s30] sm:$0xff] %v216_v37 }
  0xaf PF: > { %s12_s9 = sadd.s32 1, %s296_s9  }
  0xb0   : > { %p9_p4 = scmp.ge.s32.totalorder %s12_s9, 4  }
  0xb2   :  { %11 = sbr.rel (!%p9_p4) target bundleno = 1 (0x1), region = 58 }

</bundles_post_ra>
